<compile_context>
chip_gen: v6e
topology: v6e:2x2x1
jax: 0.10.0
libtpu: 0.0.40
codegen_flags: <defaults>
</compile_context>

<pallas_src>
import functools

import jax
import jax.numpy as jnp
import numpy as np
from jax import lax
from jax.experimental import pallas as pl
from jax.experimental.pallas import tpu as pltpu

LANE = 128


def _round_up(x, m):
    return ((x + m - 1) // m) * m


def _silu(x):
    # exp and reciprocal both run on the EUP slot (frees VALU in the epilogue).
    return x * pl.reciprocal(1.0 + jnp.exp(-x), approx=True)


# ----------------------------- device heuristics ------------------------------

@functools.lru_cache(maxsize=None)
def _device_kind():
    try:
        return jax.devices()[0].device_kind.lower()
    except Exception:
        return ""


def _preferred_lane_tile():
    k = _device_kind()
    return 256 if ("v6" in k or "v7" in k) else 128


def _vmem_limit_bytes():
    k = _device_kind()
    if "v7" in k:
        return 48 * 1024 * 1024          # 64 MiB physical, leave headroom
    if "v6" in k or "v5e" in k or "v5 lite" in k or "v5litepod" in k:
        return 100 * 1024 * 1024         # 128 MiB physical
    return None                          # unknown chip: keep compiler default


def _cparams(sem, vmem):
    if vmem is not None:
        return pltpu.CompilerParams(dimension_semantics=sem, vmem_limit_bytes=vmem)
    return pltpu.CompilerParams(dimension_semantics=sem)


def _pick_tn(Cp):
    wide = _preferred_lane_tile()
    if wide > 128 and Cp % wide == 0:
        return wide
    if Cp % 128 == 0:
        return 128
    return Cp                             # narrow layer: single full-dim (masked) tile


def _pick_tile_rows(total, target):
    """Largest divisor of `total` that is a multiple of 8 and <= target (else total)."""
    if total <= target:
        return total
    for t in range(min(total, target), 0, -1):
        if total % t == 0 and t % 8 == 0:
            return t
    return total


def _pick_th(Ho, Wo, target_rows):
    """Row-tile TH dividing Ho s.t. TH*Wo is 8-aligned and <= target (else full Ho)."""
    if Ho * Wo <= target_rows:
        return Ho
    for th in range(Ho, 0, -1):
        if Ho % th:
            continue
        if th * Wo <= target_rows and (th * Wo) % 8 == 0:
            return th
    return Ho


# --------------------------------- kernels ------------------------------------

def _matmul_kernel(x_ref, w_ref, b_ref, o_ref, *, act):
    """Fused matmul + folded-BN bias + optional SiLU (im2col'd / 1x1 dense conv).

    x_ref: (1, TM, Ck) bf16 ; w_ref: (Ck, tn) bf16 ; b_ref: (1, tn) f32
    o_ref: (1, TM, tn) bf16
    """
    y = jnp.dot(x_ref[0], w_ref[...], preferred_element_type=jnp.float32) + b_ref[...]
    if act:
        y = _silu(y)
    o_ref[0] = y.astype(o_ref.dtype)


def _conv_tap_kernel(x_ref, w_ref, b_ref, o_ref, *, K, stride, Wo, TH, act):
    """Per-tap dense conv (Cin >= 128, K > 1) with stride phase decomposition.

    x_ref: (s*s, Hq, Wq, Cin) bf16 (whole padded phase image, resident across inner axes)
    w_ref: (K*K, Cin, tn) bf16 ; b_ref: (1, tn) f32 ; o_ref: (1, TH*Wo, tn) bf16
    """
    s = stride
    cin = x_ref.shape[-1]
    tn = o_ref.shape[-1]
    row0 = pl.multiple_of(pl.program_id(2) * TH, TH)
    acc = jnp.zeros((TH * Wo, tn), jnp.float32)
    for ki in range(K):
        for kj in range(K):
            phase = (ki % s) * s + (kj % s)
            oi, oj = ki // s, kj // s
            patch = x_ref[phase, pl.ds(row0 + oi, TH), oj:oj + Wo, :]
            acc = acc + jnp.dot(patch.reshape(TH * Wo, cin), w_ref[ki * K + kj],
                                preferred_element_type=jnp.float32)
    y = acc + b_ref[...]
    if act:
        y = _silu(y)
    o_ref[0] = y.astype(o_ref.dtype)


def _dw_kernel(x_ref, w_ref, b_ref, o_ref, *, K, stride, Wo, TH, act):
    """Depthwise conv (groups == n_in == n_out) + folded-BN bias + optional SiLU.

    x_ref: (s*s, Hq, Wq, tc) bf16 ; w_ref: (K*K, 1, tc) bf16 ; b_ref: (1, 1, tc) f32
    o_ref: (1, TH, Wo, tc) bf16
    """
    s = stride
    tc = o_ref.shape[-1]
    ss = x_ref.shape[0]
    max_oi = (K - 1) // s
    row0 = pl.multiple_of(pl.program_id(2) * TH, TH)
    # Hoist the bf16->f32 cast: one cast per phase per grid step instead of one per tap.
    slabs = [x_ref[ph, pl.ds(row0, TH + max_oi), :, :].astype(jnp.float32)
             for ph in range(ss)]
    acc = jnp.zeros((TH, Wo, tc), jnp.float32)
    for ki in range(K):
        for kj in range(K):
            phase = (ki % s) * s + (kj % s)
            oi, oj = ki // s, kj // s
            patch = slabs[phase][oi:oi + TH, oj:oj + Wo, :]
            tap = w_ref[ki * K + kj].astype(jnp.float32)          # (1, tc)
            acc = acc + patch * tap
    y = acc + b_ref[0]
    if act:
        y = _silu(y)
    o_ref[0] = y.astype(o_ref.dtype)


# --------------------------- pallas_call builders ------------------------------

@functools.lru_cache(maxsize=None)
def _matmul_call(N, M, Ck, Cp, TM, tn, act, vmem):
    n_ct, n_sp = Cp // tn, M // TM
    kern = functools.partial(_matmul_kernel, act=act)
    return pl.pallas_call(
        kern,
        grid=(N, n_ct, n_sp),
        in_specs=[
            pl.BlockSpec((1, TM, Ck), lambda n, j, sp: (n, sp, 0)),
            pl.BlockSpec((Ck, tn), lambda n, j, sp: (0, j)),
            pl.BlockSpec((1, tn), lambda n, j, sp: (0, j)),
        ],
        out_specs=pl.BlockSpec((1, TM, tn), lambda n, j, sp: (n, sp, j)),
        out_shape=jax.ShapeDtypeStruct((N, M, Cp), jnp.bfloat16),
        compiler_params=_cparams(("parallel", "parallel", "parallel"), vmem),
    )


@functools.lru_cache(maxsize=None)
def _tap_conv_call(N, SS, Hq, Wq, Cin, KK, Cp, Ho, Wo, TH, K, stride, act, tn, vmem):
    n_ct, n_sp = Cp // tn, Ho // TH
    kern = functools.partial(_conv_tap_kernel, K=K, stride=stride, Wo=Wo, TH=TH, act=act)
    return pl.pallas_call(
        kern,
        grid=(N, n_ct, n_sp),
        in_specs=[
            pl.BlockSpec((SS, Hq, Wq, Cin), lambda n, j, sp: (n, 0, 0, 0)),
            pl.BlockSpec((KK, Cin, tn), lambda n, j, sp: (0, 0, j)),
            pl.BlockSpec((1, tn), lambda n, j, sp: (0, j)),
        ],
        out_specs=pl.BlockSpec((1, TH * Wo, tn), lambda n, j, sp: (n, sp, j)),
        out_shape=jax.ShapeDtypeStruct((N, Ho * Wo, Cp), jnp.bfloat16),
        compiler_params=_cparams(("parallel", "parallel", "parallel"), vmem),
    )


@functools.lru_cache(maxsize=None)
def _dw_conv_call(N, SS, Hq, Wq, Cp, KK, Ho, Wo, TH, K, stride, act, tc, vmem):
    n_ct, n_sp = Cp // tc, Ho // TH
    kern = functools.partial(_dw_kernel, K=K, stride=stride, Wo=Wo, TH=TH, act=act)
    return pl.pallas_call(
        kern,
        grid=(N, n_ct, n_sp),
        in_specs=[
            pl.BlockSpec((SS, Hq, Wq, tc), lambda n, c, sp: (n, 0, 0, c)),
            pl.BlockSpec((KK, 1, tc), lambda n, c, sp: (0, 0, c)),
            pl.BlockSpec((1, 1, tc), lambda n, c, sp: (0, 0, c)),
        ],
        out_specs=pl.BlockSpec((1, TH, Wo, tc), lambda n, c, sp: (n, sp, 0, c)),
        out_shape=jax.ShapeDtypeStruct((N, Ho, Wo, Cp), jnp.bfloat16),
        compiler_params=_cparams(("parallel", "parallel", "parallel"), vmem),
    )


# --------------------------------- wrappers ------------------------------------

def _im2col(x, K, stride, padding, Ho, Wo):
    """(N,H,W,C) -> (N, Ho*Wo, K*K*C). Used only when K*K*C is small (Cin < 128) or K==1
    (where it is a pure reshape), so the extra XLA-side traffic is negligible."""
    N, H, W, C = x.shape
    if K == 1 and stride == 1 and padding == 0:
        return x.reshape(N, H * W, C)
    xp = jnp.pad(x, ((0, 0), (padding, padding), (padding, padding), (0, 0))) if padding else x
    cols = []
    for ki in range(K):
        for kj in range(K):
            cols.append(lax.slice(
                xp, (0, ki, kj, 0),
                (N, ki + (Ho - 1) * stride + 1, kj + (Wo - 1) * stride + 1, C),
                (1, stride, stride, 1)))
    pat = jnp.concatenate(cols, axis=-1)
    return pat.reshape(N, Ho * Wo, K * K * C)


def _prepare_input(x, K, stride, padding):
    """Pad (and for stride>1 phase-decompose) so the kernel only needs contiguous slices."""
    N, H, W, C = x.shape
    s = stride
    if s == 1:
        if padding:
            x = jnp.pad(x, ((0, 0), (padding, padding), (padding, padding), (0, 0)))
        return x, 1, H + 2 * padding, W + 2 * padding
    Hq = -(-(H + 2 * padding) // s)
    Wq = -(-(W + 2 * padding) // s)
    xp = jnp.pad(x, ((0, 0),
                     (padding, Hq * s - H - padding),
                     (padding, Wq * s - W - padding),
                     (0, 0)))
    xs = xp.reshape(N, Hq, s, Wq, s, C).transpose(0, 2, 4, 1, 3, 5).reshape(N * s * s, Hq, Wq, C)
    return xs, s * s, Hq, Wq


def conv_bn_act(x_nhwc, p, *, spatial_rows=1024):
    """Fused Conv2d + (eval-mode) BatchNorm + optional SiLU.  NHWC bf16 in / NHWC bf16 out."""
    K, stride, padding = p["K"], p["stride"], p["padding"]
    n_out, mode = p["n_out"], p["mode"]
    x = x_nhwc.astype(jnp.bfloat16)
    N, H, W, Cin = x.shape
    Ho = (H + 2 * padding - K) // stride + 1
    Wo = (W + 2 * padding - K) // stride + 1
    Cp = p["w"].shape[-1]
    vmem = _vmem_limit_bytes()

    if mode == "matmul":                               # dense, Cin < 128 or 1x1
        tn = _pick_tn(Cp)
        pat = _im2col(x, K, stride, padding, Ho, Wo)   # (N, Ho*Wo, K*K*Cin)
        M, Ck = Ho * Wo, K * K * Cin
        TM = _pick_tile_rows(M, max(8, spatial_rows))
        call = _matmul_call(N, M, Ck, Cp, TM, tn, p["act"], vmem)
        y = call(pat, p["w"], p["b"]).reshape(N, Ho, Wo, Cp)
    elif mode == "tap":                                # dense, K>1 and Cin >= 128
        tn = _pick_tn(Cp)
        xs, SS, Hq, Wq = _prepare_input(x, K, stride, padding)
        TH = _pick_th(Ho, Wo, spatial_rows)
        call = _tap_conv_call(N, SS, Hq, Wq, Cin, K * K, Cp, Ho, Wo, TH,
                              K, stride, p["act"], tn, vmem)
        y = call(xs, p["w"], p["b"]).reshape(N, Ho, Wo, Cp)
    else:                                              # depthwise
        tc = _pick_tn(Cp)
        if Cp != Cin:
            x = jnp.pad(x, ((0, 0), (0, 0), (0, 0), (0, Cp - Cin)))
        xs, SS, Hq, Wq = _prepare_input(x, K, stride, padding)
        TH = _pick_th(Ho, Wo, spatial_rows)
        call = _dw_conv_call(N, SS, Hq, Wq, Cp, K * K, Ho, Wo, TH,
                             K, stride, p["act"], tc, vmem)
        y = call(xs, p["w"], p["b"])

    if Cp != n_out:
        y = y[..., :n_out]
    return y


def conv_bn_act_nchw(x_nchw, p, **kw):
    """Network-boundary convenience wrapper: NCHW f32 in / NCHW f32 out."""
    x = jnp.transpose(x_nchw, (0, 2, 3, 1)).astype(jnp.bfloat16)
    y = conv_bn_act(x, p, **kw)
    return jnp.transpose(y, (0, 3, 1, 2)).astype(jnp.float32)


# ----------------------- parameter construction / folding ----------------------

def init_conv_bn_act(key, n_in, n_out, kernel_size=3, stride=1, padding=0,
                     groups=1, bn=True, act=True, bias=False):
    """Mirror of ConvBnAct.__init__ with eval-mode BatchNorm folded into the weights."""
    k_w, k_b, k_g, k_be, k_m, k_v = jax.random.split(key, 6)
    K = kernel_size
    fan_in = (n_in // groups) * K * K
    w = jax.random.normal(k_w, (n_out, n_in // groups, K, K), jnp.float32) / jnp.sqrt(
        jnp.float32(fan_in))
    conv_b = (0.1 * jax.random.normal(k_b, (n_out,), jnp.float32)
              if bias else jnp.zeros((n_out,), jnp.float32))
    if bn:
        gamma = 1.0 + 0.1 * jax.random.normal(k_g, (n_out,), jnp.float32)
        beta = 0.1 * jax.random.normal(k_be, (n_out,), jnp.float32)
        mean = 0.1 * jax.random.normal(k_m, (n_out,), jnp.float32)
        var = 1.0 + 0.1 * jax.random.uniform(k_v, (n_out,), jnp.float32)
        scale = gamma / jnp.sqrt(var + 1e-5)
        shift = beta - mean * scale
    else:
        scale = jnp.ones((n_out,), jnp.float32)
        shift = jnp.zeros((n_out,), jnp.float32)

    w_eff = w * scale[:, None, None, None]          # BN scale folded into the weights
    b_eff = conv_b * scale + shift

    p = dict(n_in=n_in, n_out=n_out, K=K, stride=stride, padding=padding,
             groups=groups, act=act, w_ref_math=w_eff, b_ref_math=b_eff)

    # Only pad output channels when n_out > 128 and not already 128-aligned
    # (narrow projections keep their real width -> no dead MXU/writeback work).
    Cp = n_out if (n_out <= LANE or n_out % LANE == 0) else _round_up(n_out, LANE)
    pad_c = Cp - n_out

    if groups == 1:
        if K == 1 or n_in < LANE:                                   # single-matmul path
            wk = jnp.transpose(w_eff, (2, 3, 1, 0)).reshape(K * K * n_in, n_out)
            wk = jnp.pad(wk, ((0, 0), (0, pad_c)))
            p["mode"], p["w"] = "matmul", wk.astype(jnp.bfloat16)   # (K*K*Cin, Cp)
        else:                                                       # per-tap path
            wk = jnp.transpose(w_eff, (2, 3, 1, 0)).reshape(K * K, n_in, n_out)
            wk = jnp.pad(wk, ((0, 0), (0, 0), (0, pad_c)))
            p["mode"], p["w"] = "tap", wk.astype(jnp.bfloat16)      # (K*K, Cin, Cp)
        p["b"] = jnp.pad(b_eff, (0, pad_c)).reshape(1, Cp)
    elif groups == n_in and n_in == n_out:
        wk = jnp.transpose(w_eff[:, 0], (1, 2, 0)).reshape(K * K, 1, n_out)
        wk = jnp.pad(wk, ((0, 0), (0, 0), (0, pad_c)))
        p["mode"], p["w"] = "dw", wk.astype(jnp.bfloat16)           # (K*K, 1, Cp)
        p["b"] = jnp.pad(b_eff, (0, pad_c)).reshape(1, 1, Cp)
    else:
        raise NotImplementedError("groups must be 1 or n_in (depthwise)")
    return p


# ------------------------------ pure-JAX reference ------------------------------

def conv_bn_act_ref(x_nhwc, p):
    """Reference forward (plain JAX, NHWC, f32 math from bf16-rounded inputs)."""
    K, s, pad, groups = p["K"], p["stride"], p["padding"], p["groups"]
    x = x_nhwc.astype(jnp.bfloat16).astype(jnp.float32)
    w = p["w_ref_math"].astype(jnp.bfloat16).astype(jnp.float32)    # (O, I/g, K, K)
    b = p["b_ref_math"]
    N, H, W, Cin = x.shape
    Ho = (H + 2 * pad - K) // s + 1
    Wo = (W + 2 * pad - K) // s + 1
    xp = jnp.pad(x, ((0, 0), (pad, pad), (pad, pad), (0, 0)))
    out = jnp.zeros((N, Ho, Wo, p["n_out"]), jnp.float32)
    for ki in range(K):
        for kj in range(K):
            patch = xp[:, ki:ki + (Ho - 1) * s + 1:s, kj:kj + (Wo - 1) * s + 1:s, :]
            if groups == 1:
                out = out + jnp.einsum("nhwc,oc->nhwo", patch, w[:, :, ki, kj],
                                       precision=lax.Precision.HIGHEST)
            else:
                out = out + patch * w[:, 0, ki, kj]
    out = out + b
    if p["act"]:
        out = out * jax.nn.sigmoid(out)
    return out


# ------------------------------------ main --------------------------------------

if __name__ == "__main__":
    key = jax.random.PRNGKey(0)
    kx, k1, k2, k3 = jax.random.split(key, 4)

    # small input consistent with the module: batch=2, 4 channels, 16x16 spatial
    x_nchw = jax.random.normal(kx, (2, 4, 16, 16), jnp.float32)

    # 1) stem-style ConvBnAct: 3x3, stride 2, pad 1, BN + SiLU  (single-matmul path)
    p1 = init_conv_bn_act(k1, n_in=4, n_out=32, kernel_size=3, stride=2,
                          padding=1, groups=1, bn=True, act=True)
    # 2) depthwise ConvBnAct: 3x3, stride 1, pad 1, groups = channels
    p2 = init_conv_bn_act(k2, n_in=32, n_out=32, kernel_size=3, stride=1,
                          padding=1, groups=32, bn=True, act=True)
    # 3) pointwise projection ConvBnAct: 1x1, BN, no activation (no channel padding)
    p3 = init_conv_bn_act(k3, n_in=32, n_out=16, kernel_size=1, stride=1,
                          padding=0, groups=1, bn=True, act=False)

    # network boundary: NCHW -> NHWC bf16 once; activations stay NHWC bf16 between layers
    x = jnp.transpose(x_nchw, (0, 2, 3, 1)).astype(jnp.bfloat16)

    # spatial_rows=32 forces >1 spatial grid steps at this tiny size to exercise row tiling
    y1 = conv_bn_act(x, p1, spatial_rows=32)
    y2 = conv_bn_act(y1, p2, spatial_rows=32)
    y3 = conv_bn_act(y2, p3)
    out_nchw = jnp.transpose(y3, (0, 3, 1, 2)).astype(jnp.float32)
    out_nchw = jax.block_until_ready(out_nchw)

    assert y1.shape == (2, 8, 8, 32), y1.shape
    assert y2.shape == (2, 8, 8, 32), y2.shape
    assert y3.shape == (2, 8, 8, 16), y3.shape
    assert out_nchw.shape == (2, 16, 8, 8), out_nchw.shape
    assert bool(jnp.all(jnp.isfinite(out_nchw)))

    def _check(y, r):
        np.testing.assert_allclose(np.asarray(y.astype(jnp.float32)), np.asarray(r),
                                   rtol=1e-2, atol=1e-2)

    # correctness vs pure-JAX reference (same bf16 input/weight rounding; kernel adds
    # approx-reciprocal sigmoid + bf16 output rounding, hence the 1e-2 tolerance)
    _check(y1, conv_bn_act_ref(x, p1))
    _check(y2, conv_bn_act_ref(y1, p2))
    _check(y3, conv_bn_act_ref(y2, p3))

    print("KERNEL_OK")
</pallas_src>

<mosaic_0001>
module attributes {stable_mosaic.version = 11 : i64} {
  func.func @_matmul_kernel(%arg0: i32, %arg1: i32, %arg2: i32, %arg3: memref<1x32x36xbf16, #tpu.memory_space<vmem>>, %arg4: memref<36x32xbf16, #tpu.memory_space<vmem>>, %arg5: memref<1x32xf32, #tpu.memory_space<vmem>>, %arg6: memref<1x32x32xbf16, #tpu.memory_space<vmem>>) attributes {dimension_semantics = [#tpu.dimension_semantics<parallel>, #tpu.dimension_semantics<parallel>, #tpu.dimension_semantics<parallel>], iteration_bounds = array<i64: 2, 1, 2>, scalar_prefetch = 0 : i64, scratch_operands = 0 : i64, tpu.core_type = #tpu.core_type<tc>, window_params = [{transform_indices = @transform_0, window_bounds = array<i64: 1, 32, 36>}, {transform_indices = @transform_1, window_bounds = array<i64: 36, 32>}, {transform_indices = @transform_2, window_bounds = array<i64: 1, 32>}, {transform_indices = @transform_3, window_bounds = array<i64: 1, 32, 32>}]} {
    %c0 = arith.constant 0 : index
    %c0_0 = arith.constant 0 : index
    %c0_1 = arith.constant 0 : index
    %0 = vector.load %arg3[%c0, %c0_0, %c0_1] : memref<1x32x36xbf16, #tpu.memory_space<vmem>>, vector<1x32x36xbf16>
    %1 = vector.shape_cast %0 : vector<1x32x36xbf16> to vector<32x36xbf16>
    %c0_2 = arith.constant 0 : index
    %c0_3 = arith.constant 0 : index
    %2 = vector.load %arg4[%c0_2, %c0_3] : memref<36x32xbf16, #tpu.memory_space<vmem>>, vector<36x32xbf16>
    %cst = arith.constant dense<0.000000e+00> : vector<32x32xf32>
    %3 = tpu.matmul %1, %2, %cst {dimension_numbers = #tpu.dot_dimension_numbers<[1], [0], [0], [1], [0, 0, 1, 1], [], []>} : vector<32x36xbf16>, vector<36x32xbf16>, vector<32x32xf32> -> vector<32x32xf32>
    %c0_4 = arith.constant 0 : index
    %c0_5 = arith.constant 0 : index
    %4 = vector.load %arg5[%c0_4, %c0_5] : memref<1x32xf32, #tpu.memory_space<vmem>>, vector<1x32xf32>
    %5 = vector.broadcast %4 : vector<1x32xf32> to vector<32x32xf32>
    %6 = arith.addf %3, %5 : vector<32x32xf32>
    %cst_6 = arith.constant 0.000000e+00 : f32
    %7 = vector.broadcast %cst_6 : f32 to vector<32x32xf32>
    %8 = arith.subf %7, %6 : vector<32x32xf32>
    %9 = math.exp %8 : vector<32x32xf32>
    %cst_7 = arith.constant 1.000000e+00 : f32
    %10 = vector.broadcast %cst_7 : f32 to vector<32x32xf32>
    %11 = arith.addf %10, %9 : vector<32x32xf32>
    %12 = tpu.reciprocal %11 {approx = true} : vector<32x32xf32> -> vector<32x32xf32>
    %13 = arith.mulf %6, %12 : vector<32x32xf32>
    %14 = arith.truncf %13 : vector<32x32xf32> to vector<32x32xbf16>
    %c0_8 = arith.constant 0 : index
    %c0_9 = arith.constant 0 : index
    %c0_10 = arith.constant 0 : index
    %15 = vector.load %arg6[%c0_8, %c0_9, %c0_10] : memref<1x32x32xbf16, #tpu.memory_space<vmem>>, vector<1x32x32xbf16>
    %16 = vector.shape_cast %15 : vector<1x32x32xbf16> to vector<32x32xbf16>
    %17 = vector.shape_cast %14 : vector<32x32xbf16> to vector<1x32x32xbf16>
    tpu.vector_store %arg6[%c0_8, %c0_9, %c0_10], %17 {strides = array<i32>} : memref<1x32x32xbf16, #tpu.memory_space<vmem>>, vector<1x32x32xbf16>,
    return
  }
  func.func @transform_0(%arg0: i32, %arg1: i32, %arg2: i32) -> (i32, i32, i32) {
    %c0_i32 = arith.constant 0 : i32
    %c0_i32_0 = arith.constant 0 : i32
    return %arg0, %arg2, %c0_i32 : i32, i32, i32
  }
  func.func @transform_1(%arg0: i32, %arg1: i32, %arg2: i32) -> (i32, i32) {
    %c0_i32 = arith.constant 0 : i32
    %c0_i32_0 = arith.constant 0 : i32
    return %c0_i32, %arg1 : i32, i32
  }
  func.func @transform_2(%arg0: i32, %arg1: i32, %arg2: i32) -> (i32, i32) {
    %c0_i32 = arith.constant 0 : i32
    %c0_i32_0 = arith.constant 0 : i32
    return %c0_i32, %arg1 : i32, i32
  }
  func.func @transform_3(%arg0: i32, %arg1: i32, %arg2: i32) -> (i32, i32, i32) {
    %c0_i32 = arith.constant 0 : i32
    return %arg0, %arg2, %arg1 : i32, i32, i32
  }
}

</mosaic_0001>

<bundles_post_ra>
// kernel: tpu_custom_call.1
= control target key start
LH: loop header
LB: loop body
LE: loop exit
PB: predicated region body
PF: predicated region fallthrough
CT: control target
= control target key end

     0   :  { %s701_s12 = smov 0   ;;  %s703_s13 = smov 0   ;;  %s771_s0 = inlined_call_operand.vmem [shape: bf16[2,64,36], index: 0, kind: input, shape index: {}]   ;;  %s772_s1 = inlined_call_operand.vmem [shape: bf16[36,32], index: 1, kind: input, shape index: {}]   ;;  %s773_s2 = inlined_call_operand.vmem [shape: f32[1,32], index: 2, kind: input, shape index: {}]   ;;  %s774_s3 = inlined_call_operand.vmem [shape: bf16[2,64,32], index: 3, kind: output, shape index: {}]  }
   0x1   :  { %s705_s14 = smov 0   ;;  %s707_s15 = smov 0  }
   0x2   :  { %s709_s16 = smov 0  }
   0x3 LB: > { %s25_s17 = sadd.s32 1, %s671_s14  ;;  %s32_s18 = sadd.s32 1, %s675_s15  ;;  %s679_s16 = sphi %s709_s16, %s13_s16   ;;  %s675_s15 = sphi %s707_s15, %s778_s15   ;;  %s671_s14 = sphi %s705_s14, %s777_s14   ;;  %s667_s13 = sphi %s703_s13, %s776_s13   ;;  %s663_s12 = sphi %s701_s12, %s775_s12  }
   0x4   : > { %p26_p0 = scmp.ge.s32.totalorder %s25_s17, 2  ;;  %p539_p1 = scmp.ge.s32.totalorder %s679_s16, 1 }
   0x5   : > { %p184_p2 = scmp.lt.s32.totalorder %s679_s16, 5 }
   0x6   : > { %s780_s17 = smov (%p26_p0, %s25_s17), 0  ;;  %s782_s18 = smov (!%p26_p0, %s32_s18), %s675_s15 }
   0x7   : > { %p185_p3 = pnand %p539_p1, %p184_p2  ;;  %p34_p4 = scmp.ge.s32.totalorder %s782_s18, 2 }
   0x8   : > { %s540_s23 = sshll.u32 (!%p185_p3), %s663_s12, 2  ;;  %p227_p5 = scmp.lt.s32.totalorder (!%p185_p3), %s667_s13, 1 }
   0x9   : > { %s784_s18 = smov (%p34_p4, %s782_s18), 0  ;;  %188 = sbr.rel (%p185_p3) target bundleno = 267 (0x10b), region = 32 }
   0xa   : > { %p229_p6 = scmp.lt.s32.totalorder (!%p185_p3), %s540_s23, 7 }
   0xe   : > { %v620_v0 = vld [vmem:[%s772_s1 + $0x10] ss:$0 sps:$4 sm:$0x33]   ;;  %vm305_vm0 = vcmask 1041408   ;;  %v621_v1 = vld [vmem:[%s772_s1 + $0x8] sm:$0xff]   ;;  %v622_v3 = vld [vmem:[%s772_s1] sm:$0xff]  }
   0xf   : > { %579 = vmatprep.subr.msk.bf16.mxu0 %vm305_vm0, %v620_v0  ;;  %v307_v2 = vsel %vm305_vm0, %v620_v0, 0  ;;  %s786_s13 = smov (!%p227_p5, %s667_s13), 1  ;;  %s788_s23 = smov (!%p229_p6, %s540_s23), 7  ;;  %vm298_vm1 = vcmask 293888   ;;  %v546_v6 = vld [vmem:[%s773_s2] ss:$0 sm:$0xff] }
  0x10   : > { %570 = vmatpush3.bf16.msra.mxu0 %v307_v2  ;;  %s541_s26 = sshll.u32 %s786_s13, 3  ;;  %vm398_vm2 = vcmask 257024  }
  0x11   : > { %571 = vmatprep.subr.bf16.mxu0 %v621_v1  ;;  %s740_s27 = sadd.s32 %s541_s26, %s788_s23 }
  0x12   : > { %s542_s28 = sshll.u32 %s740_s27, 2 }
  0x13   : > { %s234_s4 = scalar_lea.vmem %s771_s0, %s542_s28  ;;  %s254_s9 = scalar_lea.vmem %s774_s3, %s542_s28 }
  0x14   : > { %572 = vmatpush3.bf16.msra.mxu0 %v621_v1  ;;  %v623_v4 = vld [vmem:[%s234_s4] sm:$0xff]   ;;  %v624_v5 = vld [vmem:[%s234_s4 + $0x8] sm:$0xff]  }
  0x15   : > { %573 = vmatprep.subr.bf16.mxu0 %v622_v3  ;;  %575 = vmatprep.mubr.msk.bf16.mxu0 %vm298_vm1, %v623_v4 }
  0x18   : > { %574 = vmatpush3.bf16.msra.mxu0 %v622_v3 }
  0x1b   : > { %576 = vmatmul.mubr.msk.bf16.vlgmr.msra.gmra.mxu0 %vm298_vm1, %v624_v5 }
  0xdb   : > { %v577_v7 = vpop.f32.mrf.mxu0 }
  0xdc   : > { %v352_v8 = vadd.f32 %v577_v7, %v546_v6 }
  0xdd   : > { %v343_v9 = vpop.f32.mrf.mxu0 }
  0xde   : > { %v360_v10 = vsub.f32 0.0, %v352_v8  ;;  %v344_v11 = vadd.f32 %v546_v6, %v343_v9 }
  0xdf   : > { %v578_v12 = vpop.f32.mrf.mxu0 }
  0xe0   : > { %v366_v13 = vmul.f32 1.442695, %v360_v10  ;;  %v358_v14 = vsub.f32 0.0, %v344_v11  ;;  %v355_v15 = vadd.f32 %v578_v12, %v546_v6 }
  0xe1   : > { %v346_v16 = vpop.f32.mrf.mxu0 }
  0xe2   : > { %625 = vpow2.f32 %v366_v13  ;;  %v362_v17 = vmul.f32 1.442695, %v358_v14  ;;  %v361_v18 = vsub.f32 0.0, %v355_v15  ;;  %v347_v19 = vadd.f32 %v546_v6, %v346_v16 }
  0xe4   : > { %627 = vpow2.f32 %v362_v17  ;;  %v368_v20 = vmul.f32 1.442695, %v361_v18  ;;  %v359_v21 = vsub.f32 0.0, %v347_v19 }
  0xe6   : > { %629 = vpow2.f32 %v368_v20  ;;  %v364_v22 = vmul.f32 1.442695, %v359_v21 }
  0xe8   : > { %631 = vpow2.f32 %v364_v22 }
  0xef   : > { %v626_v23 = vpop.eup %625 }
  0xf0   : > { %v372_v24 = vadd.f32 1.0, %v626_v23 }
  0xf1   : > { %v628_v25 = vpop.eup %627 }
  0xf2   : > { %633 = vrcp.f32 %v372_v24  ;;  %v370_v26 = vadd.f32 1.0, %v628_v25 }
  0xf3   : > { %v630_v27 = vpop.eup %629 }
  0xf4   : > { %635 = vrcp.f32 %v370_v26  ;;  %v373_v28 = vadd.f32 1.0, %v630_v27 }
  0xf5   : > { %v632_v29 = vpop.eup %631 }
  0xf6   : > { %637 = vrcp.f32 %v373_v28  ;;  %v371_v30 = vadd.f32 1.0, %v632_v29 }
  0xf8   : > { %639 = vrcp.f32 %v371_v30 }
  0xff   : > { %v634_v31 = vpop.eup %633 }
 0x100   : > { %v380_v32 = vmul.f32 %v634_v31, %v352_v8 }
 0x101   : > { %v636_v33 = vpop.eup %635 }
 0x102   : > { %v562_v34 = vpack.c.bf16 %v380_v32, %v380_v32  ;;  %v378_v35 = vmul.f32 %v636_v33, %v344_v11 }
 0x103   : > { %v638_v36 = vpop.eup %637 }
 0x104   : > { %401 = vst.msk [vmem:[%s254_s9 + $0x8] sm:$0xf] %vm398_vm2, %v562_v34  ;;  %v560_v37 = vpack.c.bf16 %v378_v35, %v378_v35  ;;  %v381_v38 = vmul.f32 %v638_v36, %v355_v15 }
 0x105   : > { %v640_v39 = vpop.eup %639 }
 0x106   : > { %399 = vst.msk [vmem:[%s254_s9] sm:$0xf] %vm398_vm2, %v560_v37  ;;  %v563_v40 = vpack.c.bf16 %v381_v38, %v381_v38  ;;  %v379_v41 = vmul.f32 %v640_v39, %v347_v19 }
 0x108   : > { %402 = vst.msk [vmem:[%s254_s9 + $0xc] sm:$0xf] %vm398_vm2, %v563_v40  ;;  %v561_v42 = vpack.c.bf16 %v379_v41, %v379_v41 }
 0x10a   : > { %400 = vst.msk [vmem:[%s254_s9 + $0x4] sm:$0xf] %vm398_vm2, %v561_v42 }
 0x10b PF: > { %s13_s16 = sadd.s32 1, %s679_s16   ;;  %s775_s12 = smov %s671_s14 }
 0x10c   : > { %p10_p7 = scmp.ge.s32.totalorder %s13_s16, 6   ;;  %s776_s13 = smov %s675_s15 }
 0x10d   : > { %s777_s14 = smov %s780_s17  ;;  %s778_s15 = smov %s784_s18 }
 0x10e   :  { %12 = sbr.rel (!%p10_p7) target bundleno = 3 (0x3), region = 68 }

</bundles_post_ra>
